<compile_context>
chip_gen: v7x
topology: tpu7x:2x2x1
jax: 0.10.0
libtpu: 0.0.40
codegen_flags: <defaults>
</compile_context>

<pallas_src>
import functools

import jax
import jax.numpy as jnp
from jax.experimental import pallas as pl
from jax.experimental.pallas import tpu as pltpu


MAX_TILE_B = 1024  # cap on batch-tile rows per grid step


def _round_up(n, m):
    return ((n + m - 1) // m) * m


def _cdiv(a, b):
    return (a + b - 1) // b


def _tpu_generation():
    """Best-effort TPU generation sniff (falls back to 6 => v6e-style defaults)."""
    try:
        kind = jax.devices()[0].device_kind.lower()
    except Exception:
        return 6
    for gen in (7, 6, 5, 4):
        if f"v{gen}" in kind:
            return gen
    return 6


_TPU_GEN = _tpu_generation()
_NUM_TC = 2 if _TPU_GEN >= 7 else 1          # v7x has 2 TensorCores/chip
_HID2_PAD = 128 if _TPU_GEN <= 5 else 256    # MXU granule: 128 (v4/v5), 256 (v6e/v7x)
_BF16_EPILOGUE = _TPU_GEN >= 6               # bf16 VALU only on v6e/v7x


def _head_math(x, w1, b1, w2, b2, w3, b3, *, bf16_epilogue):
    """Linear->ReLU->Linear->ReLU->Linear; bf16 MXU operands, f32 accumulation."""
    xb = x.astype(jnp.bfloat16)
    a1 = jnp.dot(xb, w1, preferred_element_type=jnp.float32)
    if bf16_epilogue:
        h1 = jnp.maximum(a1.astype(jnp.bfloat16) + b1.astype(jnp.bfloat16), 0)
    else:
        h1 = jnp.maximum(a1 + b1, 0.0).astype(jnp.bfloat16)

    a2 = jnp.dot(h1, w2, preferred_element_type=jnp.float32)
    if bf16_epilogue:
        h2 = jnp.maximum(a2.astype(jnp.bfloat16) + b2.astype(jnp.bfloat16), 0)
    else:
        h2 = jnp.maximum(a2 + b2, 0.0).astype(jnp.bfloat16)

    # Final layer: small-N matmul, lane-exact [tile_b, output_dim] f32 result.
    return jnp.dot(h2, w3, preferred_element_type=jnp.float32) + b3


def _ddqn_head_kernel(x_ref,
                      w1_ref, b1_ref,
                      w2_ref, b2_ref,
                      w3_ref, b3_ref,
                      o_ref, *, bf16_epilogue):
    """Fused head on one batch tile.

    x_ref:  [tile_b, in_dim]   f32 (cast to bf16 in-kernel)
    w*_ref: [in, out]          bf16 (pre-transposed, zero-padded hidden dims)
    b*_ref: [1, out]           f32
    o_ref:  [tile_b, out_dim]  f32
    """
    out = _head_math(x_ref[...],
                     w1_ref[...], b1_ref[...],
                     w2_ref[...], b2_ref[...],
                     w3_ref[...], b3_ref[...],
                     bf16_epilogue=bf16_epilogue)
    o_ref[...] = out.astype(o_ref.dtype)


def _choose_batch_tiling(batch, num_splits):
    """Pick (tile_b, padded_batch).

    Single full-batch tile when one TC is targeted (or batch is tiny); otherwise
    >= num_splits balanced tiles (multiples of 8 sublanes), capped at MAX_TILE_B.
    """
    if batch <= MAX_TILE_B and (num_splits <= 1 or batch < 16):
        return batch, batch  # one tile covering the whole batch; no padding needed
    tile = min(MAX_TILE_B, _round_up(_cdiv(batch, max(num_splits, 1)), 8))
    return tile, _round_up(batch, tile)


@functools.partial(jax.jit, static_argnames=("bf16_epilogue", "num_splits"))
def ddqn_forward(x, params, *, bf16_epilogue=_BF16_EPILOGUE, num_splits=_NUM_TC):
    """DDQN head forward. x: [B, input_dim] f32 (extra dims flattened). -> [B, output_dim] f32."""
    (w1, b1), (w2, b2), (w3, b3) = params
    if x.ndim > 2:
        x = x.reshape(x.shape[0], -1)
    B, in_dim = x.shape
    assert in_dim == w1.shape[0], (in_dim, w1.shape)
    out_dim = w3.shape[1]

    tile_b, b_pad = _choose_batch_tiling(B, num_splits)
    if b_pad != B:
        x = jnp.pad(x, ((0, b_pad - B), (0, 0)))

    resident = lambda arr: pl.BlockSpec(arr.shape, lambda i: (0, 0))
    kernel = functools.partial(_ddqn_head_kernel, bf16_epilogue=bf16_epilogue)

    out = pl.pallas_call(
        kernel,
        out_shape=jax.ShapeDtypeStruct((b_pad, out_dim), jnp.float32),
        grid=(b_pad // tile_b,),
        in_specs=[
            pl.BlockSpec((tile_b, in_dim), lambda i: (i, 0)),
            resident(w1), resident(b1),
            resident(w2), resident(b2),
            resident(w3), resident(b3),
        ],
        out_specs=pl.BlockSpec((tile_b, out_dim), lambda i: (i, 0)),
        compiler_params=pltpu.CompilerParams(
            dimension_semantics=("parallel",)),
    )(x, w1, b1, w2, b2, w3, b3)

    if b_pad != B:
        out = out[:B]
    return out


def make_linear_params(key, fan_in, fan_out, fan_in_pad=None, fan_out_pad=None):
    """torch.nn.Linear-style init U(-1/sqrt(fan_in), 1/sqrt(fan_in)).

    Weight returned as [fan_in(_pad), fan_out(_pad)] bf16 (pre-transposed, zero-padded).
    Bias returned as [1, fan_out(_pad)] f32.
    """
    kw, kb = jax.random.split(key)
    bound = 1.0 / float(fan_in) ** 0.5
    w = jax.random.uniform(kw, (fan_in, fan_out), jnp.float32, -bound, bound)
    b = jax.random.uniform(kb, (1, fan_out), jnp.float32, -bound, bound)
    if fan_in_pad is not None and fan_in_pad > fan_in:
        w = jnp.pad(w, ((0, fan_in_pad - fan_in), (0, 0)))
    if fan_out_pad is not None and fan_out_pad > fan_out:
        w = jnp.pad(w, ((0, 0), (0, fan_out_pad - fan_out)))
        b = jnp.pad(b, ((0, 0), (0, fan_out_pad - fan_out)))
    return w.astype(jnp.bfloat16), b


def make_ddqn_params(key, input_dim, output_dim, hidden_pad=_HID2_PAD):
    """(w, b) for the 3 head layers. The 128-wide hidden dims (layer-2 out / layer-3 in)
    are zero-padded to `hidden_pad` to match the MXU granule; padding is math-neutral."""
    k1, k2, k3 = jax.random.split(key, 3)
    p1 = make_linear_params(k1, input_dim, 256)
    p2 = make_linear_params(k2, 256, 128, fan_out_pad=hidden_pad)
    p3 = make_linear_params(k3, 128, output_dim, fan_in_pad=hidden_pad)
    return (p1, p2, p3)


# Pure-JAX reference with identical numerics (same bf16/f32 mix) for correctness checking.
def ddqn_forward_ref(x, params, *, bf16_epilogue=_BF16_EPILOGUE):
    (w1, b1), (w2, b2), (w3, b3) = params
    if x.ndim > 2:
        x = x.reshape(x.shape[0], -1)
    return _head_math(x, w1, b1, w2, b2, w3, b3, bf16_epilogue=bf16_epilogue)


if __name__ == "__main__":
    key = jax.random.PRNGKey(0)
    k_x, k_p = jax.random.split(key)

    B = 256          # replay-minibatch-sized batch (1 tile on v5e/v6e, 2 on v7x)
    INPUT_DIM = 32   # DDQN(input_dim=32, ...), shared_network=None
    OUTPUT_DIM = 4   # e.g. 4 discrete actions

    x = jax.random.normal(k_x, (B, INPUT_DIM), jnp.float32)
    params = make_ddqn_params(k_p, INPUT_DIM, OUTPUT_DIM, hidden_pad=_HID2_PAD)

    out = jax.block_until_ready(
        ddqn_forward(x, params, bf16_epilogue=_BF16_EPILOGUE, num_splits=_NUM_TC))
    ref = ddqn_forward_ref(x, params, bf16_epilogue=_BF16_EPILOGUE)

    assert out.shape == (B, OUTPUT_DIM), out.shape
    assert jnp.allclose(out, ref, atol=2e-2, rtol=2e-2), \
        float(jnp.max(jnp.abs(out - ref)))

    print("KERNEL_OK")
</pallas_src>

<mosaic_0001>
module attributes {stable_mosaic.version = 11 : i64} {
  func.func @_ddqn_head_kernel(%arg0: i32, %arg1: memref<256x32xf32, #tpu.memory_space<vmem>>, %arg2: memref<32x256xbf16, #tpu.memory_space<vmem>>, %arg3: memref<1x256xf32, #tpu.memory_space<vmem>>, %arg4: memref<256x256xbf16, #tpu.memory_space<vmem>>, %arg5: memref<1x256xf32, #tpu.memory_space<vmem>>, %arg6: memref<256x4xbf16, #tpu.memory_space<vmem>>, %arg7: memref<1x4xf32, #tpu.memory_space<vmem>>, %arg8: memref<256x4xf32, #tpu.memory_space<vmem>>) attributes {dimension_semantics = [#tpu.dimension_semantics<parallel>], iteration_bounds = array<i64: 1>, scalar_prefetch = 0 : i64, scratch_operands = 0 : i64, tpu.core_type = #tpu.core_type<tc>, window_params = [{transform_indices = @transform_0, window_bounds = array<i64: 256, 32>}, {pipeline_mode = #tpu.pipeline_mode<synchronous>, transform_indices = @transform_1, window_bounds = array<i64: 32, 256>}, {pipeline_mode = #tpu.pipeline_mode<synchronous>, transform_indices = @transform_2, window_bounds = array<i64: 1, 256>}, {pipeline_mode = #tpu.pipeline_mode<synchronous>, transform_indices = @transform_3, window_bounds = array<i64: 256, 256>}, {pipeline_mode = #tpu.pipeline_mode<synchronous>, transform_indices = @transform_4, window_bounds = array<i64: 1, 256>}, {pipeline_mode = #tpu.pipeline_mode<synchronous>, transform_indices = @transform_5, window_bounds = array<i64: 256, 4>}, {pipeline_mode = #tpu.pipeline_mode<synchronous>, transform_indices = @transform_6, window_bounds = array<i64: 1, 4>}, {transform_indices = @transform_7, window_bounds = array<i64: 256, 4>}]} {
    %c0 = arith.constant 0 : index
    %c0_0 = arith.constant 0 : index
    %0 = vector.load %arg1[%c0, %c0_0] : memref<256x32xf32, #tpu.memory_space<vmem>>, vector<256x32xf32>
    %c0_1 = arith.constant 0 : index
    %c0_2 = arith.constant 0 : index
    %1 = vector.load %arg2[%c0_1, %c0_2] : memref<32x256xbf16, #tpu.memory_space<vmem>>, vector<32x256xbf16>
    %c0_3 = arith.constant 0 : index
    %c0_4 = arith.constant 0 : index
    %2 = vector.load %arg3[%c0_3, %c0_4] : memref<1x256xf32, #tpu.memory_space<vmem>>, vector<1x256xf32>
    %c0_5 = arith.constant 0 : index
    %c0_6 = arith.constant 0 : index
    %3 = vector.load %arg4[%c0_5, %c0_6] : memref<256x256xbf16, #tpu.memory_space<vmem>>, vector<256x256xbf16>
    %c0_7 = arith.constant 0 : index
    %c0_8 = arith.constant 0 : index
    %4 = vector.load %arg5[%c0_7, %c0_8] : memref<1x256xf32, #tpu.memory_space<vmem>>, vector<1x256xf32>
    %c0_9 = arith.constant 0 : index
    %c0_10 = arith.constant 0 : index
    %5 = vector.load %arg6[%c0_9, %c0_10] : memref<256x4xbf16, #tpu.memory_space<vmem>>, vector<256x4xbf16>
    %c0_11 = arith.constant 0 : index
    %c0_12 = arith.constant 0 : index
    %6 = vector.load %arg7[%c0_11, %c0_12] : memref<1x4xf32, #tpu.memory_space<vmem>>, vector<1x4xf32>
    %7 = arith.truncf %0 : vector<256x32xf32> to vector<256x32xbf16>
    %cst = arith.constant dense<0.000000e+00> : vector<256x256xf32>
    %8 = tpu.matmul %7, %1, %cst {dimension_numbers = #tpu.dot_dimension_numbers<[1], [0], [0], [1], [0, 0, 1, 1], [], []>} : vector<256x32xbf16>, vector<32x256xbf16>, vector<256x256xf32> -> vector<256x256xf32>
    %9 = arith.truncf %8 : vector<256x256xf32> to vector<256x256xbf16>
    %10 = arith.truncf %2 : vector<1x256xf32> to vector<1x256xbf16>
    %11 = vector.broadcast %10 : vector<1x256xbf16> to vector<256x256xbf16>
    %12 = arith.addf %9, %11 : vector<256x256xbf16>
    %cst_13 = arith.constant 0.000000e+00 : bf16
    %13 = vector.broadcast %cst_13 : bf16 to vector<256x256xbf16>
    %14 = arith.maximumf %12, %13 : vector<256x256xbf16>
    %cst_14 = arith.constant dense<0.000000e+00> : vector<256x256xf32>
    %15 = tpu.matmul %14, %3, %cst_14 {dimension_numbers = #tpu.dot_dimension_numbers<[1], [0], [0], [1], [0, 0, 1, 1], [], []>} : vector<256x256xbf16>, vector<256x256xbf16>, vector<256x256xf32> -> vector<256x256xf32>
    %16 = arith.truncf %15 : vector<256x256xf32> to vector<256x256xbf16>
    %17 = arith.truncf %4 : vector<1x256xf32> to vector<1x256xbf16>
    %18 = vector.broadcast %17 : vector<1x256xbf16> to vector<256x256xbf16>
    %19 = arith.addf %16, %18 : vector<256x256xbf16>
    %cst_15 = arith.constant 0.000000e+00 : bf16
    %20 = vector.broadcast %cst_15 : bf16 to vector<256x256xbf16>
    %21 = arith.maximumf %19, %20 : vector<256x256xbf16>
    %cst_16 = arith.constant dense<0.000000e+00> : vector<256x4xf32>
    %22 = tpu.matmul %21, %5, %cst_16 {dimension_numbers = #tpu.dot_dimension_numbers<[1], [0], [0], [1], [0, 0, 1, 1], [], []>} : vector<256x256xbf16>, vector<256x4xbf16>, vector<256x4xf32> -> vector<256x4xf32>
    %23 = vector.broadcast %6 : vector<1x4xf32> to vector<256x4xf32>
    %24 = arith.addf %22, %23 : vector<256x4xf32>
    %c0_17 = arith.constant 0 : index
    %c0_18 = arith.constant 0 : index
    %25 = vector.load %arg8[%c0_17, %c0_18] : memref<256x4xf32, #tpu.memory_space<vmem>>, vector<256x4xf32>
    tpu.vector_store %arg8[%c0_17, %c0_18], %24 {strides = array<i32>} : memref<256x4xf32, #tpu.memory_space<vmem>>, vector<256x4xf32>,
    return
  }
  func.func @transform_0(%arg0: i32) -> (i32, i32) {
    %c0_i32 = arith.constant 0 : i32
    %c0_i32_0 = arith.constant 0 : i32
    return %arg0, %c0_i32 : i32, i32
  }
  func.func @transform_1(%arg0: i32) -> (i32, i32) {
    %c0_i32 = arith.constant 0 : i32
    %c0_i32_0 = arith.constant 0 : i32
    %c0_i32_1 = arith.constant 0 : i32
    return %c0_i32, %c0_i32_0 : i32, i32
  }
  func.func @transform_2(%arg0: i32) -> (i32, i32) {
    %c0_i32 = arith.constant 0 : i32
    %c0_i32_0 = arith.constant 0 : i32
    %c0_i32_1 = arith.constant 0 : i32
    return %c0_i32, %c0_i32_0 : i32, i32
  }
  func.func @transform_3(%arg0: i32) -> (i32, i32) {
    %c0_i32 = arith.constant 0 : i32
    %c0_i32_0 = arith.constant 0 : i32
    %c0_i32_1 = arith.constant 0 : i32
    return %c0_i32, %c0_i32_0 : i32, i32
  }
  func.func @transform_4(%arg0: i32) -> (i32, i32) {
    %c0_i32 = arith.constant 0 : i32
    %c0_i32_0 = arith.constant 0 : i32
    %c0_i32_1 = arith.constant 0 : i32
    return %c0_i32, %c0_i32_0 : i32, i32
  }
  func.func @transform_5(%arg0: i32) -> (i32, i32) {
    %c0_i32 = arith.constant 0 : i32
    %c0_i32_0 = arith.constant 0 : i32
    %c0_i32_1 = arith.constant 0 : i32
    return %c0_i32, %c0_i32_0 : i32, i32
  }
  func.func @transform_6(%arg0: i32) -> (i32, i32) {
    %c0_i32 = arith.constant 0 : i32
    %c0_i32_0 = arith.constant 0 : i32
    %c0_i32_1 = arith.constant 0 : i32
    return %c0_i32, %c0_i32_0 : i32, i32
  }
  func.func @transform_7(%arg0: i32) -> (i32, i32) {
    %c0_i32 = arith.constant 0 : i32
    %c0_i32_0 = arith.constant 0 : i32
    return %arg0, %c0_i32 : i32, i32
  }
}

</mosaic_0001>

<bundles_post_ra>
// kernel: ddqn_forward.1
= control target key start
LH: loop header
LB: loop body
LE: loop exit
PB: predicated region body
PF: predicated region fallthrough
CT: control target
= control target key end

     0   :  { %v1563_v1 = vmov 0   ;;  %vm166_vm0 = vcmask 261120   ;;  %vm1270_vm1 = vcmask 31744   ;;  %s2253_s1 = inlined_call_operand.vmem [shape: bf16[32,256], index: 1, kind: input, shape index: {}]   ;;  %s2254_s0 = inlined_call_operand.vmem [shape: f32[256,32], index: 0, kind: input, shape index: {}]   ;;  %s2255_s3 = inlined_call_operand.vmem [shape: bf16[256,256], index: 3, kind: input, shape index: {}]   ;;  %s2256_s2 = inlined_call_operand.vmem [shape: f32[1,256], index: 2, kind: input, shape index: {}]   ;;  %s2257_s5 = inlined_call_operand.vmem [shape: bf16[256,4], index: 5, kind: input, shape index: {}]   ;;  %s2258_s4 = inlined_call_operand.vmem [shape: f32[1,256], index: 4, kind: input, shape index: {}]   ;;  %s2259_s6 = inlined_call_operand.vmem [shape: f32[1,4], index: 6, kind: input, shape index: {}]   ;;  %s2260_s7 = inlined_call_operand.vmem [shape: f32[256,4], index: 7, kind: output, shape index: {}]  }
   0x1   :  { %v1493_v0 = vld [vmem:[%s2253_s1 + $0x4] ss:$8 sps:$4 sm:$0xff]   ;;  %247 = vmatprep.mubr.bf16.mxu0 %v1563_v1  ;;  %327 = vmatprep.mubr.bf16.mxu1 %v1563_v1  ;;  %v1495_v2 = vld [vmem:[%s2253_s1] ss:$8 sps:$4 sm:$0xff]   ;;  %v1496_v3 = vld [vmem:[%s2253_s1 + $0x14] ss:$8 sps:$4 sm:$0xff]  }
   0x2   :  { %215 = vmatprep.subr.bf16.mxu0 %v1493_v0  ;;  %1488 = vmatprep.subr.bf16.mxu1 %v1493_v0  ;;  %v1498_v4 = vld [vmem:[%s2253_s1 + $0x10] ss:$8 sps:$4 sm:$0xff]   ;;  %v27_v5 = vld [vmem:[%s2254_s0] sm:$0xff]  ;;  %v28_v6 = vld [vmem:[%s2254_s0 + $0x8] sm:$0xff] }
   0x3   :  { %216 = vmatpush1.bf16.msra.mxu0 %v1495_v2  ;;  %1490 = vmatpush1.bf16.msra.mxu1 %v1495_v2  ;;  %v130_v7 = vpack.c.bf16 %v28_v6, %v27_v5  ;;  %v43_v8 = vld [vmem:[%s2254_s0 + $0x80] sm:$0xff]  ;;  %v44_v9 = vld [vmem:[%s2254_s0 + $0x88] sm:$0xff]  ;;  %v29_v11 = vld [vmem:[%s2254_s0 + $0x10] sm:$0xff] }
   0x4   :  { %217 = vmatprep.subr.bf16.mxu0 %v1496_v3  ;;  %1489 = vmatprep.subr.bf16.mxu1 %v1496_v3  ;;  %v138_v10 = vpack.c.bf16 %v44_v9, %v43_v8  ;;  %v30_v12 = vld [vmem:[%s2254_s0 + $0x18] sm:$0xff]  ;;  %v45_v13 = vld [vmem:[%s2254_s0 + $0x90] sm:$0xff]  ;;  %v1499_v16 = vld [vmem:[%s2255_s3] ss:$8 sps:$4 sm:$0xff]  }
   0x5   :  { %v46_v14 = vld [vmem:[%s2254_s0 + $0x98] sm:$0xff]  ;;  %v131_v15 = vpack.c.bf16 %v30_v12, %v29_v11  ;;  %v1501_v17 = vld [vmem:[%s2255_s3 + $0x4] ss:$8 sps:$4 sm:$0xff]   ;;  %v1505_v26 = vld [vmem:[%s2255_s3 + $0x20] ss:$8 sps:$4 sm:$0xff]  }
   0x6   :  { %v139_v18 = vpack.c.bf16 %v46_v14, %v45_v13  ;;  %v1504_v19 = vld [vmem:[%s2255_s3 + $0x14] ss:$8 sps:$4 sm:$0xff]   ;;  %v1502_v20 = vld [vmem:[%s2255_s3 + $0x10] ss:$8 sps:$4 sm:$0xff]   ;;  %v31_v21 = vld [vmem:[%s2254_s0 + $0x20] sm:$0xff] }
   0x7   :  { %218 = vmatpush1.bf16.msra.mxu0 %v1498_v4  ;;  %1491 = vmatpush1.bf16.msra.mxu1 %v1498_v4  ;;  %v1507_v22 = vld [vmem:[%s2255_s3 + $0x24] ss:$8 sps:$4 sm:$0xff]   ;;  %v1510_v28 = vld [vmem:[%s2255_s3 + $0x34] ss:$8 sps:$4 sm:$0xff]   ;;  %v1508_v30 = vld [vmem:[%s2255_s3 + $0x30] ss:$8 sps:$4 sm:$0xff]  }
   0x8   :  { %691 = vmatprep.subr.bf16.mxu1 %v1501_v17  ;;  %v32_v23 = vld [vmem:[%s2254_s0 + $0x28] sm:$0xff]  ;;  %v47_v24 = vld [vmem:[%s2254_s0 + $0xa0] sm:$0xff]  ;;  %v33_v31 = vld [vmem:[%s2254_s0 + $0x30] sm:$0xff] }
   0x9   :  { %v48_v25 = vld [vmem:[%s2254_s0 + $0xa8] sm:$0xff]  ;;  %v132_v27 = vpack.c.bf16 %v32_v23, %v31_v21  ;;  %v34_v33 = vld [vmem:[%s2254_s0 + $0x38] sm:$0xff]  ;;  %v49_v34 = vld [vmem:[%s2254_s0 + $0xb0] sm:$0xff] }
   0xa   :  { %1311 = vmatmul.mubr.msk.bf16.vlgmr.msra.gmra.mrb[0].mxu0 %vm166_vm0, %v130_v7  ;;  %1319 = vmatmul.mubr.msk.bf16.vlgmr.msra.gmra.mrb[0].mxu1 %vm166_vm0, %v138_v10  ;;  %v140_v29 = vpack.c.bf16 %v48_v25, %v47_v24  ;;  %v1513_v32 = vld [vmem:[%s2255_s3 + $0x44] ss:$8 sps:$4 sm:$0xff]   ;;  %v50_v35 = vld [vmem:[%s2254_s0 + $0xb8] sm:$0xff]  ;;  %v1511_v36 = vld [vmem:[%s2255_s3 + $0x40] ss:$8 sps:$4 sm:$0xff]   ;;  %v133_v37 = vpack.c.bf16 %v34_v33, %v33_v31 }
   0xb   :  { %257 = vmatprep.mubr.bf16.mxu0 %v1563_v1  ;;  %337 = vmatprep.mubr.bf16.mxu1 %v1563_v1  ;;  %v1516_v38 = vld [vmem:[%s2255_s3 + $0x54] ss:$8 sps:$4 sm:$0xff]   ;;  %v141_v39 = vpack.c.bf16 %v50_v35, %v49_v34  ;;  %v1514_v40 = vld [vmem:[%s2255_s3 + $0x50] ss:$8 sps:$4 sm:$0xff]   ;;  %v1519_v41 = vld [vmem:[%s2255_s3 + $0x64] ss:$8 sps:$4 sm:$0xff]  }
   0xc   :  { %692 = vmatpush1.bf16.msra.mxu1 %v1499_v16  ;;  %v35_v42 = vld [vmem:[%s2254_s0 + $0x40] sm:$0xff]  ;;  %v36_v43 = vld [vmem:[%s2254_s0 + $0x48] sm:$0xff]  ;;  %v1522_v48 = vld [vmem:[%s2255_s3 + $0x74] ss:$8 sps:$4 sm:$0xff]  }
   0xd   :  { %693 = vmatprep.subr.bf16.mxu1 %v1504_v19  ;;  %v51_v44 = vld [vmem:[%s2254_s0 + $0xc0] sm:$0xff]  ;;  %v52_v45 = vld [vmem:[%s2254_s0 + $0xc8] sm:$0xff]  ;;  %v134_v47 = vpack.c.bf16 %v36_v43, %v35_v42  ;;  %v1520_v50 = vld [vmem:[%s2255_s3 + $0x70] ss:$8 sps:$4 sm:$0xff]  }
   0xe   :  { %v1517_v46 = vld [vmem:[%s2255_s3 + $0x60] ss:$8 sps:$4 sm:$0xff]   ;;  %v142_v49 = vpack.c.bf16 %v52_v45, %v51_v44  ;;  %v1525_v51 = vld [vmem:[%s2255_s3 + $0x84] ss:$8 sps:$4 sm:$0xff]   ;;  %v37_v52 = vld [vmem:[%s2254_s0 + $0x50] sm:$0xff] }
   0xf   :  { %v38_v53 = vld [vmem:[%s2254_s0 + $0x58] sm:$0xff]  ;;  %v53_v54 = vld [vmem:[%s2254_s0 + $0xd0] sm:$0xff]  ;;  %v1523_v56 = vld [vmem:[%s2255_s3 + $0x80] ss:$8 sps:$4 sm:$0xff]  }
  0x10   :  { %694 = vmatpush1.bf16.msra.mxu1 %v1502_v20  ;;  %v54_v55 = vld [vmem:[%s2254_s0 + $0xd8] sm:$0xff]  ;;  %v135_v57 = vpack.c.bf16 %v38_v53, %v37_v52  ;;  %v1531_v61 = vld [vmem:[%s2255_s3 + $0xa4] ss:$8 sps:$4 sm:$0xff]   ;;  %v1529_v3 = vld [vmem:[%s2255_s3 + $0xa0] ss:$8 sps:$4 sm:$0xff]  }
  0x11   :  { %695 = vmatprep.subr.bf16.mxu1 %v1507_v22  ;;  %v1528_v58 = vld [vmem:[%s2255_s3 + $0x94] ss:$8 sps:$4 sm:$0xff]   ;;  %v143_v59 = vpack.c.bf16 %v54_v55, %v53_v54  ;;  %v1526_v60 = vld [vmem:[%s2255_s3 + $0x90] ss:$8 sps:$4 sm:$0xff]   ;;  %v39_v62 = vld [vmem:[%s2254_s0 + $0x60] sm:$0xff]  ;;  %v441_v22 = vlaneseq }
  0x12   :  { %1312 = vmatmul.mubr.msk.bf16.gmra.mrb[4].mxu0 %vm166_vm0, %v131_v15  ;;  %1320 = vmatmul.mubr.msk.bf16.gmra.mrb[4].mxu1 %vm166_vm0, %v139_v18  ;;  %v40_v63 = vld [vmem:[%s2254_s0 + $0x68] sm:$0xff]  ;;  %v55_v0 = vld [vmem:[%s2254_s0 + $0xe0] sm:$0xff]  ;;  %v1534_v5 = vld [vmem:[%s2255_s3 + $0xb4] ss:$8 sps:$4 sm:$0xff]  }
  0x13   :  { %267 = vmatprep.mubr.bf16.mxu0 %v1563_v1  ;;  %347 = vmatprep.mubr.bf16.mxu1 %v1563_v1  ;;  %v56_v2 = vld [vmem:[%s2254_s0 + $0xe8] sm:$0xff]  ;;  %v136_v4 = vpack.c.bf16 %v40_v63, %v39_v62  ;;  %v1532_v7 = vld [vmem:[%s2255_s3 + $0xb0] ss:$8 sps:$4 sm:$0xff]   ;;  %v1540_v15 = vld [vmem:[%s2255_s3 + $0xd4] ss:$8 sps:$4 sm:$0xff]   ;;  %v1840_v23 = vshrl.u32 %v441_v22, 7 }
  0x14   :  { %696 = vmatpush1.bf16.msra.mxu1 %v1505_v26  ;;  %v144_v6 = vpack.c.bf16 %v56_v2, %v55_v0  ;;  %v1537_v8 = vld [vmem:[%s2255_s3 + $0xc4] ss:$8 sps:$4 sm:$0xff]   ;;  %v41_v9 = vld [vmem:[%s2254_s0 + $0x70] sm:$0xff]  ;;  %v42_v10 = vld [vmem:[%s2254_s0 + $0x78] sm:$0xff] }
  0x15   :  { %697 = vmatprep.subr.bf16.mxu1 %v1510_v28  ;;  %v57_v11 = vld [vmem:[%s2254_s0 + $0xf0] sm:$0xff]  ;;  %v58_v12 = vld [vmem:[%s2254_s0 + $0xf8] sm:$0xff]  ;;  %v1535_v13 = vld [vmem:[%s2255_s3 + $0xc0] ss:$8 sps:$4 sm:$0xff]   ;;  %v137_v14 = vpack.c.bf16 %v42_v10, %v41_v9  ;;  %v1843_v24 = vsub.s32 0, %v1840_v23  ;;  %v447_v26 = vsub.s32 1, %v1840_v23 }
  0x16   :  { %v145_v16 = vpack.c.bf16 %v58_v12, %v57_v11  ;;  %v1538_v17 = vld [vmem:[%s2255_s3 + $0xd0] ss:$8 sps:$4 sm:$0xff]   ;;  %v1543_v18 = vld [vmem:[%s2255_s3 + $0xe4] ss:$8 sps:$4 sm:$0xff]   ;;  %v1541_v19 = vld [vmem:[%s2255_s3 + $0xe0] ss:$8 sps:$4 sm:$0xff]  }
  0x17   :  { %v1546_v20 = vld [vmem:[%s2255_s3 + $0xf4] ss:$8 sps:$4 sm:$0xff]   ;;  %v1544_v21 = vld [vmem:[%s2255_s3 + $0xf0] ss:$8 sps:$4 sm:$0xff]   ;;  %v63_v25 = vld [vmem:[%s2256_s2] sm:$0x3] }
  0x18   :  { %698 = vmatpush1.bf16.msra.mxu1 %v1508_v30  ;;  %v448_v28 = vrot.slane %v63_v25, %v447_v26  ;;  %v1549_v52 = vld [vmem:[%s2257_s5 + $0x48] sm:$0xff]   ;;  %v1552_v62 = vld [vmem:[%s2257_s5 + $0x10] sm:$0xff]   ;;  %v1554_v12 = vld [vmem:[%s2257_s5 + $0x18] sm:$0xff]  }
  0x19   :  { %699 = vmatprep.subr.bf16.mxu1 %v1513_v32  ;;  %v1550_v53 = vld [vmem:[%s2257_s5 + $0x8] sm:$0xff]  }
  0x1a   :  { %1313 = vmatmul.mubr.msk.bf16.gmra.mrb[8].mxu0 %vm166_vm0, %v132_v27  ;;  %1321 = vmatmul.mubr.msk.bf16.gmra.mrb[8].mxu1 %vm166_vm0, %v140_v29  ;;  %v444_v27 = vrot.slane %v63_v25, %v1843_v24  ;;  %v452_v30 = vpack.c.bf16 %v448_v28, %v448_v28 }
  0x1b   :  { %277 = vmatprep.mubr.bf16.mxu0 %v1563_v1  ;;  %357 = vmatprep.mubr.bf16.mxu1 %v1563_v1 }
  0x1c   :  { %700 = vmatpush1.bf16.msra.mxu1 %v1511_v36  ;;  %v451_v29 = vpack.c.bf16 %v444_v27, %v444_v27  ;;  %v461_v32 = vpack.i.b16 %v452_v30, %v452_v30 }
  0x1d   :  { %701 = vmatprep.subr.bf16.mxu1 %v1516_v38 }
  0x1e   :  { %v454_v31 = vpack.i.b16 %v451_v29, %v451_v29  ;;  %v1856_v38 = vrot.slane %v461_v32, %v1843_v24 }
  0x20   :  { %702 = vmatpush1.bf16.msra.mxu1 %v1514_v40  ;;  %v1853_v35 = vrot.slane %v454_v31, %v1843_v24  ;;  %v1557_v31 = vld [vmem:[%s2257_s5 + $0x68] sm:$0xff]  }
  0x21   :  { %703 = vmatprep.subr.bf16.mxu1 %v1519_v41 }
  0x22   :  { %1314 = vmatmul.mubr.msk.bf16.gmra.mrb[12].mxu0 %vm166_vm0, %v133_v37  ;;  %1322 = vmatmul.mubr.msk.bf16.gmra.mrb[12].mxu1 %vm166_vm0, %v141_v39 }
  0x23   :  { %287 = vmatprep.mubr.bf16.mxu0 %v1563_v1  ;;  %367 = vmatprep.mubr.bf16.mxu1 %v1563_v1 }
  0x24   :  { %704 = vmatpush1.bf16.msra.mxu1 %v1517_v46  ;;  %v1547_v46 = vld [vmem:[%s2257_s5 + $0x40] sm:$0xff]  }
  0x25   :  { %705 = vmatprep.subr.bf16.mxu1 %v1522_v48  ;;  %1376 = vmatprep.subr.bf16.mxu0 %v1547_v46 }
  0x28   :  { %706 = vmatpush1.bf16.msra.mxu1 %v1520_v50 }
  0x29   :  { %707 = vmatprep.subr.bf16.mxu1 %v1525_v51 }
  0x2a   :  { %1315 = vmatmul.mubr.msk.bf16.gmra.mrb[16].mxu0 %vm166_vm0, %v134_v47  ;;  %1323 = vmatmul.mubr.msk.bf16.gmra.mrb[16].mxu1 %vm166_vm0, %v142_v49  ;;  %v1548_v49 = vld [vmem:[%s2257_s5] sm:$0xff]  }
  0x2b   :  { %297 = vmatprep.mubr.bf16.mxu0 %v1563_v1  ;;  %377 = vmatprep.mubr.bf16.mxu1 %v1563_v1 }
  0x2c   :  { %708 = vmatpush1.bf16.msra.mxu1 %v1523_v56  ;;  %1377 = vmatpush3.bf16.msra.mxu0 %v1548_v49  ;;  %v1551_v56 = vld [vmem:[%s2257_s5 + $0x50] sm:$0xff]  }
  0x2d   :  { %709 = vmatprep.subr.bf16.mxu1 %v1528_v58  ;;  %1378 = vmatprep.subr.bf16.mxu0 %v1549_v52 }
  0x30   :  { %710 = vmatpush1.bf16.msra.mxu1 %v1526_v60  ;;  %1379 = vmatpush3.bf16.msra.mxu0 %v1550_v53 }
  0x31   :  { %711 = vmatprep.subr.bf16.mxu1 %v1531_v61  ;;  %1380 = vmatprep.subr.bf16.mxu0 %v1551_v56 }
  0x32   :  { %1316 = vmatmul.mubr.msk.bf16.gmra.mrb[20].mxu0 %vm166_vm0, %v135_v57  ;;  %1324 = vmatmul.mubr.msk.bf16.gmra.mrb[20].mxu1 %vm166_vm0, %v143_v59 }
  0x33   :  { %307 = vmatprep.mubr.bf16.mxu0 %v1563_v1  ;;  %387 = vmatprep.mubr.bf16.mxu1 %v1563_v1 }
  0x34   :  { %712 = vmatpush1.bf16.msra.mxu1 %v1529_v3  ;;  %1381 = vmatpush3.bf16.msra.mxu0 %v1552_v62 }
  0x35   :  { %713 = vmatprep.subr.bf16.mxu1 %v1534_v5 }
  0x38   :  { %714 = vmatpush1.bf16.msra.mxu1 %v1532_v7 }
  0x39   :  { %715 = vmatprep.subr.bf16.mxu1 %v1537_v8 }
  0x3a   :  { %1317 = vmatmul.mubr.msk.bf16.gmra.mrb[24].mxu0 %vm166_vm0, %v136_v4  ;;  %1325 = vmatmul.mubr.msk.bf16.gmra.mrb[24].mxu1 %vm166_vm0, %v144_v6  ;;  %v1553_v6 = vld [vmem:[%s2257_s5 + $0x58] sm:$0xff]  }
  0x3b   :  { %317 = vmatprep.mubr.bf16.mxu0 %v1563_v1  ;;  %397 = vmatprep.mubr.bf16.mxu1 %v1563_v1 }
  0x3c   :  { %716 = vmatpush1.bf16.msra.mxu1 %v1535_v13  ;;  %1382 = vmatprep.subr.bf16.mxu0 %v1553_v6 }
  0x3d   :  { %717 = vmatprep.subr.bf16.mxu1 %v1540_v15  ;;  %v1555_v15 = vld [vmem:[%s2257_s5 + $0x60] sm:$0xff]   ;;  %1383 = vmatpush3.bf16.msra.mxu0 %v1554_v12 }
  0x3e   :  { %1384 = vmatprep.subr.bf16.mxu0 %v1555_v15 }
  0x40   :  { %718 = vmatpush1.bf16.msra.mxu1 %v1538_v17 }
  0x41   :  { %719 = vmatprep.subr.bf16.mxu1 %v1543_v18 }
  0x42   :  { %1318 = vmatmul.mubr.msk.bf16.gmra.mrb[28].mxu0 %vm166_vm0, %v137_v14  ;;  %1326 = vmatmul.mubr.msk.bf16.gmra.mrb[28].mxu1 %vm166_vm0, %v145_v16 }
  0x44   :  { %720 = vmatpush1.bf16.msra.mxu1 %v1541_v19  ;;  %v1556_v19 = vld [vmem:[%s2257_s5 + $0x20] sm:$0xff]  }
  0x45   :  { %721 = vmatprep.subr.bf16.mxu1 %v1546_v20  ;;  %1385 = vmatpush3.bf16.msra.mxu0 %v1556_v19 }
  0x46   :  { %1386 = vmatprep.subr.bf16.mxu0 %v1557_v31 }
  0x48   :  { %722 = vmatpush1.bf16.msra.mxu1 %v1544_v21 }
  0xdd   :  { %v249_v33 = vpop.f32.mrb[0].mxu0  ;;  %v329_v36 = vpop.f32.mrb[0].mxu1 }
  0xde   :  { %v251_v34 = vpop.f32.mrb[1].mxu0  ;;  %v1858_v39 = vpop.f32.mrb[1].mxu1 }
  0xdf   :  { %v253_v37 = vpop.f32.mrb[2].mxu0  ;;  %v333_v42 = vpop.f32.mrb[2].mxu1 }
  0xe0   :  { %v408_v40 = vpack.c.bf16 %v253_v37, %v249_v33  ;;  %v255_v41 = vpop.f32.mrb[3].mxu0  ;;  %v424_v44 = vpack.c.bf16 %v333_v42, %v329_v36  ;;  %v1860_v45 = vpop.f32.mrb[3].mxu1 }
  0xe1   :  { %v409_v43 = vpack.c.bf16 %v255_v41, %v251_v34  ;;  %v425_v48 = vpack.c.bf16 %v1860_v45, %v1858_v39 }
  0xe2   :  { %v467_v47 = vadd.bf16 %v1853_v35, %v408_v40  ;;  %v1873_v51 = vadd.bf16 %v1853_v35, %v424_v44  ;;  %v1558_v40 = vld [vmem:[%s2257_s5 + $0x28] sm:$0xff]  }
  0xe3   :  { %v468_v50 = vadd.bf16 %v1856_v38, %v409_v43  ;;  %v1559_v43 = vld [vmem:[%s2257_s5 + $0x70] sm:$0xff]   ;;  %1387 = vmatpush3.bf16.msra.mxu0 %v1558_v40 }
  0xe4   :  { %v499_v57 = vmax.bf16 %v1563_v1, %v467_v47  ;;  %1388 = vmatprep.subr.bf16.mxu0 %v1559_v43  ;;  %v515_v45 = vmax.bf16 %v1563_v1, %v1873_v51 }
  0xe5   :  { %v259_v54 = vpop.f32.mrb[4].mxu0  ;;  %v500_v55 = vmax.bf16 %v1563_v1, %v468_v50  ;;  %v339_v59 = vpop.f32.mrb[4].mxu1 }
  0xe6   :  { %v261_v58 = vpop.f32.mrb[5].mxu0  ;;  %v341_v61 = vpop.f32.mrb[5].mxu1 }
  0xe7   :  { %v263_v60 = vpop.f32.mrb[6].mxu0  ;;  %723 = vmatprep.mubr.bf16.mxu1 %v500_v55  ;;  %v343_v2 = vpop.f32.mrb[6].mxu1  ;;  %v1560_v55 = vld [vmem:[%s2257_s5 + $0x30] sm:$0xff]  }
  0xe8   :  { %v410_v63 = vpack.c.bf16 %v263_v60, %v259_v54  ;;  %v265_v0 = vpop.f32.mrb[7].mxu0  ;;  %724 = vmatmul.mubr.bf16.vlgmr.msra.gmra.mrb[32].mxu1 %v499_v57  ;;  %v426_v4 = vpack.c.bf16 %v343_v2, %v339_v59  ;;  %v345_v5 = vpop.f32.mrb[7].mxu1  ;;  %1389 = vmatpush3.bf16.msra.mxu0 %v1560_v55 }
  0xe9   :  { %v411_v3 = vpack.c.bf16 %v265_v0, %v261_v58  ;;  %v427_v8 = vpack.c.bf16 %v345_v5, %v341_v61 }
  0xea   :  { %v469_v7 = vadd.bf16 %v1853_v35, %v410_v63  ;;  %v1895_v10 = vadd.bf16 %v1853_v35, %v426_v4 }
  0xeb   :  { %v470_v9 = vadd.bf16 %v1856_v38, %v411_v3  ;;  %v1898_v11 = vadd.bf16 %v1856_v38, %v427_v8 }
  0xec   :  { %v501_v17 = vmax.bf16 %v1563_v1, %v469_v7 }
  0xed   :  { %v269_v13 = vpop.f32.mrb[8].mxu0  ;;  %v502_v14 = vmax.bf16 %v1563_v1, %v470_v9  ;;  %v349_v18 = vpop.f32.mrb[8].mxu1  ;;  %v518_v39 = vmax.bf16 %v1563_v1, %v1898_v11 }
  0xee   :  { %v271_v16 = vpop.f32.mrb[9].mxu0  ;;  %v351_v21 = vpop.f32.mrb[9].mxu1 }
  0xef   :  { %v273_v20 = vpop.f32.mrb[10].mxu0  ;;  %733 = vmatprep.mubr.bf16.mxu1 %v502_v14  ;;  %v353_v27 = vpop.f32.mrb[10].mxu1 }
  0xf0   :  { %v412_v22 = vpack.c.bf16 %v273_v20, %v269_v13  ;;  %v275_v25 = vpop.f32.mrb[11].mxu0  ;;  %734 = vmatmul.mubr.bf16.gmra.mrb[36].mxu1 %v501_v17  ;;  %v428_v29 = vpack.c.bf16 %v353_v27, %v349_v18  ;;  %v355_v30 = vpop.f32.mrb[11].mxu1 }
  0xf1   :  { %v413_v28 = vpack.c.bf16 %v275_v25, %v271_v16  ;;  %v429_v33 = vpack.c.bf16 %v355_v30, %v351_v21 }
  0xf2   :  { %v471_v32 = vadd.bf16 %v1853_v35, %v412_v22  ;;  %v1917_v36 = vadd.bf16 %v1853_v35, %v428_v29 }
  0xf3   :  { %v472_v34 = vadd.bf16 %v1856_v38, %v413_v28  ;;  %v1920_v37 = vadd.bf16 %v1856_v38, %v429_v33 }
  0xf4   :  { %v503_v46 = vmax.bf16 %v1563_v1, %v471_v32 }
  0xf5   :  { %v279_v41 = vpop.f32.mrb[12].mxu0  ;;  %v504_v42 = vmax.bf16 %v1563_v1, %v472_v34  ;;  %v359_v47 = vpop.f32.mrb[12].mxu1 }
  0xf6   :  { %v281_v44 = vpop.f32.mrb[13].mxu0  ;;  %v361_v50 = vpop.f32.mrb[13].mxu1 }
  0xf7   :  { %v283_v49 = vpop.f32.mrb[14].mxu0  ;;  %743 = vmatprep.mubr.bf16.mxu1 %v504_v42  ;;  %v363_v54 = vpop.f32.mrb[14].mxu1 }
  0xf8   :  { %v414_v52 = vpack.c.bf16 %v283_v49, %v279_v41  ;;  %v285_v53 = vpop.f32.mrb[15].mxu0  ;;  %744 = vmatmul.mubr.bf16.gmra.mrb[40].mxu1 %v503_v46  ;;  %v430_v57 = vpack.c.bf16 %v363_v54, %v359_v47  ;;  %v365_v58 = vpop.f32.mrb[15].mxu1 }
  0xf9   :  { %v415_v56 = vpack.c.bf16 %v285_v53, %v281_v44  ;;  %v431_v60 = vpack.c.bf16 %v365_v58, %v361_v50 }
  0xfa   :  { %v473_v59 = vadd.bf16 %v1853_v35, %v414_v52  ;;  %v1936_v62 = vadd.bf16 %v1853_v35, %v430_v57 }
  0xfb   :  { %v474_v61 = vadd.bf16 %v1856_v38, %v415_v56  ;;  %v1939_v63 = vadd.bf16 %v1856_v38, %v431_v60 }
  0xfc   :  { %v505_v4 = vmax.bf16 %v1563_v1, %v473_v59  ;;  %v521_v11 = vmax.bf16 %v1563_v1, %v1936_v62 }
  0xfd   :  { %v289_v0 = vpop.f32.mrb[16].mxu0  ;;  %v506_v2 = vmax.bf16 %v1563_v1, %v474_v61  ;;  %v369_v5 = vpop.f32.mrb[16].mxu1 }
  0xfe   :  { %v291_v3 = vpop.f32.mrb[17].mxu0  ;;  %v371_v7 = vpop.f32.mrb[17].mxu1 }
  0xff   :  { %v293_v6 = vpop.f32.mrb[18].mxu0  ;;  %753 = vmatprep.mubr.bf16.mxu1 %v506_v2  ;;  %v373_v12 = vpop.f32.mrb[18].mxu1 }
 0x100   :  { %v416_v8 = vpack.c.bf16 %v293_v6, %v289_v0  ;;  %v295_v9 = vpop.f32.mrb[19].mxu0  ;;  %754 = vmatmul.mubr.bf16.gmra.mrb[44].mxu1 %v505_v4  ;;  %v432_v14 = vpack.c.bf16 %v373_v12, %v369_v5  ;;  %v375_v15 = vpop.f32.mrb[19].mxu1 }
 0x101   :  { %v417_v13 = vpack.c.bf16 %v295_v9, %v291_v3  ;;  %v433_v17 = vpack.c.bf16 %v375_v15, %v371_v7 }
 0x102   :  { %v475_v16 = vadd.bf16 %v1853_v35, %v416_v8  ;;  %v1946_v19 = vadd.bf16 %v1853_v35, %v432_v14 }
 0x103   :  { %v476_v18 = vadd.bf16 %v1856_v38, %v417_v13  ;;  %v1949_v20 = vadd.bf16 %v1856_v38, %v433_v17 }
 0x104   :  { %v507_v27 = vmax.bf16 %v1563_v1, %v475_v16 }
 0x105   :  { %v299_v21 = vpop.f32.mrb[20].mxu0  ;;  %v508_v22 = vmax.bf16 %v1563_v1, %v476_v18  ;;  %v379_v28 = vpop.f32.mrb[20].mxu1  ;;  %v524_v51 = vmax.bf16 %v1563_v1, %v1949_v20 }
 0x106   :  { %v301_v25 = vpop.f32.mrb[21].mxu0  ;;  %v381_v30 = vpop.f32.mrb[21].mxu1 }
 0x107   :  { %v303_v29 = vpop.f32.mrb[22].mxu0  ;;  %763 = vmatprep.mubr.bf16.mxu1 %v508_v22  ;;  %v383_v33 = vpop.f32.mrb[22].mxu1  ;;  %v484_v22 = vadd.bf16 %v1856_v38, %v425_v48  ;;  %v522_v48 = vmax.bf16 %v1563_v1, %v1939_v63  ;;  %v523_v63 = vmax.bf16 %v1563_v1, %v1946_v19  ;;  %v96_v19 = vld [vmem:[%s2258_s4] sm:$0x3] }
 0x108   :  { %v418_v31 = vpack.c.bf16 %v303_v29, %v299_v21  ;;  %v305_v32 = vpop.f32.mrb[23].mxu0  ;;  %764 = vmatmul.mubr.bf16.gmra.mrb[48].mxu1 %v507_v27  ;;  %v434_v40 = vpack.c.bf16 %v383_v33, %v379_v28  ;;  %v385_v41 = vpop.f32.mrb[23].mxu1 }
 0x109   :  { %v419_v34 = vpack.c.bf16 %v305_v32, %v301_v25  ;;  %v435_v43 = vpack.c.bf16 %v385_v41, %v381_v30  ;;  %v519_v41 = vmax.bf16 %v1563_v1, %v1917_v36 }
 0x10a   :  { %v477_v42 = vadd.bf16 %v1853_v35, %v418_v31  ;;  %v1956_v46 = vadd.bf16 %v1853_v35, %v434_v40 }
 0x10b   :  { %v478_v44 = vadd.bf16 %v1856_v38, %v419_v34  ;;  %v1959_v47 = vadd.bf16 %v1856_v38, %v435_v43  ;;  %v516_v34 = vmax.bf16 %v1563_v1, %v484_v22 }
 0x10c   :  { %v509_v53 = vmax.bf16 %v1563_v1, %v477_v42  ;;  %v525_v20 = vmax.bf16 %v1563_v1, %v1956_v46  ;;  %v924_v46 = vrot.slane %v96_v19, %v447_v26 }
 0x10d   :  { %v309_v49 = vpop.f32.mrb[24].mxu0  ;;  %v510_v50 = vmax.bf16 %v1563_v1, %v478_v44  ;;  %v389_v54 = vpop.f32.mrb[24].mxu1  ;;  %v526_v36 = vmax.bf16 %v1563_v1, %v1959_v47  ;;  %v920_v47 = vrot.slane %v96_v19, %v1843_v24 }
 0x10e   :  { %v311_v52 = vpop.f32.mrb[25].mxu0  ;;  %v391_v56 = vpop.f32.mrb[25].mxu1 }
 0x10f   :  { %v313_v55 = vpop.f32.mrb[26].mxu0  ;;  %773 = vmatprep.mubr.bf16.mxu1 %v510_v50  ;;  %v393_v59 = vpop.f32.mrb[26].mxu1  ;;  %v928_v50 = vpack.c.bf16 %v924_v46, %v924_v46 }
 0x110   :  { %v420_v57 = vpack.c.bf16 %v313_v55, %v309_v49  ;;  %v315_v58 = vpop.f32.mrb[27].mxu0  ;;  %774 = vmatmul.mubr.bf16.gmra.mrb[52].mxu1 %v509_v53  ;;  %v436_v61 = vpack.c.bf16 %v393_v59, %v389_v54  ;;  %v395_v0 = vpop.f32.mrb[27].mxu1  ;;  %v927_v49 = vpack.c.bf16 %v920_v47, %v920_v47 }
 0x111   :  { %v421_v60 = vpack.c.bf16 %v315_v58, %v311_v52  ;;  %v437_v3 = vpack.c.bf16 %v395_v0, %v391_v56  ;;  %v937_v53 = vpack.i.b16 %v928_v50, %v928_v50 }
 0x112   :  { %v479_v2 = vadd.bf16 %v1853_v35, %v420_v57  ;;  %v495_v5 = vadd.bf16 %v1853_v35, %v436_v61  ;;  %v930_v52 = vpack.i.b16 %v927_v49, %v927_v49 }
 0x113   :  { %v480_v4 = vadd.bf16 %v1856_v38, %v421_v60  ;;  %v496_v6 = vadd.bf16 %v1856_v38, %v437_v3  ;;  %v2022_v58 = vrot.slane %v937_v53, %v1843_v24 }
 0x114   :  { %v511_v12 = vmax.bf16 %v1563_v1, %v479_v2  ;;  %v527_v43 = vmax.bf16 %v1563_v1, %v495_v5  ;;  %v2019_v56 = vrot.slane %v930_v52, %v1843_v24 }
 0x115   :  { %v319_v7 = vpop.f32.mrb[28].mxu0  ;;  %v512_v8 = vmax.bf16 %v1563_v1, %v480_v4  ;;  %v399_v13 = vpop.f32.mrb[28].mxu1  ;;  %v528_v62 = vmax.bf16 %v1563_v1, %v496_v6 }
 0x116   :  { %v321_v9 = vpop.f32.mrb[29].mxu0  ;;  %v401_v15 = vpop.f32.mrb[29].mxu1 }
 0x117   :  { %v323_v14 = vpop.f32.mrb[30].mxu0  ;;  %783 = vmatprep.mubr.bf16.mxu1 %v512_v8  ;;  %v403_v18 = vpop.f32.mrb[30].mxu1 }
 0x118   :  { %v422_v16 = vpack.c.bf16 %v323_v14, %v319_v7  ;;  %v325_v17 = vpop.f32.mrb[31].mxu0  ;;  %784 = vmatmul.mubr.bf16.gmra.mrb[56].mxu1 %v511_v12  ;;  %v438_v25 = vpack.c.bf16 %v403_v18, %v399_v13  ;;  %v405_v27 = vpop.f32.mrb[31].mxu1 }
 0x119   :  { %v423_v21 = vpack.c.bf16 %v325_v17, %v321_v9  ;;  %v439_v29 = vpack.c.bf16 %v405_v27, %v401_v15 }
 0x11a   :  { %v481_v28 = vadd.bf16 %v1853_v35, %v422_v16  ;;  %v497_v31 = vadd.bf16 %v1853_v35, %v438_v25  ;;  %v520_v35 = vmax.bf16 %v1563_v1, %v1920_v37  ;;  %v1562_v37 = vld [vmem:[%s2257_s5 + $0x38] sm:$0xff]  }
 0x11b   :  { %v482_v30 = vadd.bf16 %v1856_v38, %v423_v21  ;;  %v498_v32 = vadd.bf16 %v1856_v38, %v439_v29  ;;  %v517_v38 = vmax.bf16 %v1563_v1, %v1895_v10  ;;  %v1561_v10 = vld [vmem:[%s2257_s5 + $0x78] sm:$0xff]  }
 0x11c   :  { %v513_v40 = vmax.bf16 %v1563_v1, %v481_v28  ;;  %1390 = vmatprep.subr.bf16.mxu0 %v1561_v10  ;;  %v529_v44 = vmax.bf16 %v1563_v1, %v497_v31 }
 0x11d   :  { %v514_v33 = vmax.bf16 %v1563_v1, %v482_v30  ;;  %1391 = vmatpush3.bf16.msra.mxu0 %v1562_v37  ;;  %v530_v42 = vmax.bf16 %v1563_v1, %v498_v32 }
 0x11f   :  { %793 = vmatprep.mubr.bf16.mxu1 %v514_v33 }
 0x120   :  { %794 = vmatmul.mubr.bf16.gmra.mrb[60].mxu1 %v513_v40 }
 0x121   :  { %803 = vmatprep.mubr.bf16.mxu1 %v516_v34 }
 0x128   :  { %804 = vmatmul.mubr.bf16.gmra.mrb[64].mxu1 %v515_v45 }
 0x129   :  { %813 = vmatprep.mubr.bf16.mxu1 %v518_v39 }
 0x130   :  { %814 = vmatmul.mubr.bf16.gmra.mrb[68].mxu1 %v517_v38 }
 0x131   :  { %823 = vmatprep.mubr.bf16.mxu1 %v520_v35 }
 0x138   :  { %824 = vmatmul.mubr.bf16.gmra.mrb[72].mxu1 %v519_v41 }
 0x139   :  { %833 = vmatprep.mubr.bf16.mxu1 %v522_v48 }
 0x140   :  { %834 = vmatmul.mubr.bf16.gmra.mrb[76].mxu1 %v521_v11 }
 0x141   :  { %843 = vmatprep.mubr.bf16.mxu1 %v524_v51 }
 0x148   :  { %844 = vmatmul.mubr.bf16.gmra.mrb[80].mxu1 %v523_v63 }
 0x149   :  { %853 = vmatprep.mubr.bf16.mxu1 %v526_v36 }
 0x150   :  { %854 = vmatmul.mubr.bf16.gmra.mrb[84].mxu1 %v525_v20 }
 0x151   :  { %863 = vmatprep.mubr.bf16.mxu1 %v528_v62 }
 0x158   :  { %864 = vmatmul.mubr.bf16.gmra.mrb[88].mxu1 %v527_v43 }
 0x159   :  { %873 = vmatprep.mubr.bf16.mxu1 %v530_v42 }
 0x160   :  { %874 = vmatmul.mubr.bf16.gmra.mrb[92].mxu1 %v529_v44 }
 0x1bb   :  { %v725_v54 = vpop.f32.mrb[32].mxu1 }
 0x1bc   :  { %v727_v55 = vpop.f32.mrb[33].mxu1 }
 0x1bd   :  { %v729_v57 = vpop.f32.mrb[34].mxu1 }
 0x1be   :  { %v884_v59 = vpack.c.bf16 %v729_v57, %v725_v54  ;;  %v731_v60 = vpop.f32.mrb[35].mxu1 }
 0x1bf   :  { %v885_v61 = vpack.c.bf16 %v731_v60, %v727_v55 }
 0x1c0   :  { %v943_v0 = vadd.bf16 %v2019_v56, %v884_v59 }
 0x1c1   :  { %v944_v23 = vadd.bf16 %v2022_v58, %v885_v61 }
 0x1c2   :  { %v975_v3 = vmax.bf16 %v1563_v1, %v943_v0 }
 0x1c3   :  { %v735_v26 = vpop.f32.mrb[36].mxu1  ;;  %v976_v2 = vmax.bf16 %v1563_v1, %v944_v23 }
 0x1c4   :  { %v737_v4 = vpop.f32.mrb[37].mxu1 }
 0x1c5   :  { %v739_v5 = vpop.f32.mrb[38].mxu1  ;;  %1141 = vmatprep.mubr.bf16.mxu0 %v976_v2 }
 0x1c6   :  { %v886_v6 = vpack.c.bf16 %v739_v5, %v735_v26  ;;  %v741_v7 = vpop.f32.mrb[39].mxu1  ;;  %1142 = vmatmul.mubr.bf16.vlgmr.msra.gmra.mrb[32].mxu0 %v975_v3 }
 0x1c7   :  { %v887_v24 = vpack.c.bf16 %v741_v7, %v737_v4 }
 0x1c8   :  { %v945_v8 = vadd.bf16 %v2019_v56, %v886_v6 }
 0x1c9   :  { %v946_v9 = vadd.bf16 %v2022_v58, %v887_v24 }
 0x1ca   :  { %v977_v15 = vmax.bf16 %v1563_v1, %v945_v8 }
 0x1cb   :  { %v745_v12 = vpop.f32.mrb[40].mxu1  ;;  %v978_v13 = vmax.bf16 %v1563_v1, %v946_v9 }
 0x1cc   :  { %v747_v14 = vpop.f32.mrb[41].mxu1 }
 0x1cd   :  { %v749_v16 = vpop.f32.mrb[42].mxu1  ;;  %1149 = vmatprep.mubr.bf16.mxu0 %v978_v13 }
 0x1ce   :  { %v888_v17 = vpack.c.bf16 %v749_v16, %v745_v12  ;;  %v751_v18 = vpop.f32.mrb[43].mxu1  ;;  %1150 = vmatmul.mubr.bf16.gmra.mrb[36].mxu0 %v977_v15 }
 0x1cf   :  { %v889_v21 = vpack.c.bf16 %v751_v18, %v747_v14 }
 0x1d0   :  { %v947_v22 = vadd.bf16 %v2019_v56, %v888_v17 }
 0x1d1   :  { %v948_v25 = vadd.bf16 %v2022_v58, %v889_v21 }
 0x1d2   :  { %v979_v30 = vmax.bf16 %v1563_v1, %v947_v22 }
 0x1d3   :  { %v755_v27 = vpop.f32.mrb[44].mxu1  ;;  %v980_v28 = vmax.bf16 %v1563_v1, %v948_v25 }
 0x1d4   :  { %v757_v29 = vpop.f32.mrb[45].mxu1 }
 0x1d5   :  { %v759_v31 = vpop.f32.mrb[46].mxu1  ;;  %1157 = vmatprep.mubr.bf16.mxu0 %v980_v28 }
 0x1d6   :  { %v890_v32 = vpack.c.bf16 %v759_v31, %v755_v27  ;;  %v761_v33 = vpop.f32.mrb[47].mxu1  ;;  %1158 = vmatmul.mubr.bf16.gmra.mrb[40].mxu0 %v979_v30 }
 0x1d7   :  { %v891_v34 = vpack.c.bf16 %v761_v33, %v757_v29 }
 0x1d8   :  { %v949_v40 = vadd.bf16 %v2019_v56, %v890_v32 }
 0x1d9   :  { %v950_v39 = vadd.bf16 %v2022_v58, %v891_v34 }
 0x1da   :  { %v981_v48 = vmax.bf16 %v1563_v1, %v949_v40 }
 0x1db   :  { %v765_v45 = vpop.f32.mrb[48].mxu1  ;;  %v982_v35 = vmax.bf16 %v1563_v1, %v950_v39 }
 0x1dc   :  { %v767_v38 = vpop.f32.mrb[49].mxu1 }
 0x1dd   :  { %v769_v41 = vpop.f32.mrb[50].mxu1  ;;  %1165 = vmatprep.mubr.bf16.mxu0 %v982_v35 }
 0x1de   :  { %v892_v51 = vpack.c.bf16 %v769_v41, %v765_v45  ;;  %v771_v11 = vpop.f32.mrb[51].mxu1  ;;  %1166 = vmatmul.mubr.bf16.gmra.mrb[44].mxu0 %v981_v48 }
 0x1df   :  { %v893_v10 = vpack.c.bf16 %v771_v11, %v767_v38 }
 0x1e0   :  { %v951_v37 = vadd.bf16 %v2019_v56, %v892_v51 }
 0x1e1   :  { %v952_v36 = vadd.bf16 %v2022_v58, %v893_v10 }
 0x1e2   :  { %v983_v42 = vmax.bf16 %v1563_v1, %v951_v37 }
 0x1e3   :  { %v775_v63 = vpop.f32.mrb[52].mxu1  ;;  %v984_v62 = vmax.bf16 %v1563_v1, %v952_v36 }
 0x1e4   :  { %v777_v20 = vpop.f32.mrb[53].mxu1 }
 0x1e5   :  { %v779_v43 = vpop.f32.mrb[54].mxu1  ;;  %1173 = vmatprep.mubr.bf16.mxu0 %v984_v62 }
 0x1e6   :  { %v894_v44 = vpack.c.bf16 %v779_v43, %v775_v63  ;;  %v781_v19 = vpop.f32.mrb[55].mxu1  ;;  %1174 = vmatmul.mubr.bf16.gmra.mrb[48].mxu0 %v983_v42 }
 0x1e7   :  { %v895_v47 = vpack.c.bf16 %v781_v19, %v777_v20 }
 0x1e8   :  { %v953_v46 = vadd.bf16 %v2019_v56, %v894_v44 }
 0x1e9   :  { %v954_v49 = vadd.bf16 %v2022_v58, %v895_v47 }
 0x1ea   :  { %v985_v54 = vmax.bf16 %v1563_v1, %v953_v46 }
 0x1eb   :  { %v785_v50 = vpop.f32.mrb[56].mxu1  ;;  %v986_v52 = vmax.bf16 %v1563_v1, %v954_v49 }
 0x1ec   :  { %v787_v53 = vpop.f32.mrb[57].mxu1 }
 0x1ed   :  { %v789_v55 = vpop.f32.mrb[58].mxu1  ;;  %1181 = vmatprep.mubr.bf16.mxu0 %v986_v52 }
 0x1ee   :  { %v896_v57 = vpack.c.bf16 %v789_v55, %v785_v50  ;;  %v791_v59 = vpop.f32.mrb[59].mxu1  ;;  %1182 = vmatmul.mubr.bf16.gmra.mrb[52].mxu0 %v985_v54 }
 0x1ef   :  { %v897_v60 = vpack.c.bf16 %v791_v59, %v787_v53 }
 0x1f0   :  { %v955_v61 = vadd.bf16 %v2019_v56, %v896_v57 }
 0x1f1   :  { %v956_v0 = vadd.bf16 %v2022_v58, %v897_v60 }
 0x1f2   :  { %v987_v3 = vmax.bf16 %v1563_v1, %v955_v61 }
 0x1f3   :  { %v795_v23 = vpop.f32.mrb[60].mxu1  ;;  %v988_v26 = vmax.bf16 %v1563_v1, %v956_v0 }
 0x1f4   :  { %v797_v2 = vpop.f32.mrb[61].mxu1 }
 0x1f5   :  { %v799_v4 = vpop.f32.mrb[62].mxu1  ;;  %1189 = vmatprep.mubr.bf16.mxu0 %v988_v26 }
 0x1f6   :  { %v898_v5 = vpack.c.bf16 %v799_v4, %v795_v23  ;;  %v801_v6 = vpop.f32.mrb[63].mxu1  ;;  %1190 = vmatmul.mubr.bf16.gmra.mrb[56].mxu0 %v987_v3 }
 0x1f7   :  { %v899_v7 = vpack.c.bf16 %v801_v6, %v797_v2 }
 0x1f8   :  { %v957_v24 = vadd.bf16 %v2019_v56, %v898_v5 }
 0x1f9   :  { %v958_v8 = vadd.bf16 %v2022_v58, %v899_v7 }
 0x1fa   :  { %v989_v14 = vmax.bf16 %v1563_v1, %v957_v24 }
 0x1fb   :  { %v805_v9 = vpop.f32.mrb[64].mxu1  ;;  %v990_v12 = vmax.bf16 %v1563_v1, %v958_v8 }
 0x1fc   :  { %v807_v13 = vpop.f32.mrb[65].mxu1 }
 0x1fd   :  { %v809_v15 = vpop.f32.mrb[66].mxu1  ;;  %1197 = vmatprep.mubr.bf16.mxu0 %v990_v12 }
 0x1fe   :  { %v900_v16 = vpack.c.bf16 %v809_v15, %v805_v9  ;;  %v811_v17 = vpop.f32.mrb[67].mxu1  ;;  %1198 = vmatmul.mubr.bf16.gmra.mrb[60].mxu0 %v989_v14 }
 0x1ff   :  { %v901_v18 = vpack.c.bf16 %v811_v17, %v807_v13 }
 0x200   :  { %v959_v21 = vadd.bf16 %v2019_v56, %v900_v16 }
 0x201   :  { %v960_v22 = vadd.bf16 %v2022_v58, %v901_v18 }
 0x202   :  { %v991_v29 = vmax.bf16 %v1563_v1, %v959_v21 }
 0x203   :  { %v815_v25 = vpop.f32.mrb[68].mxu1  ;;  %v992_v27 = vmax.bf16 %v1563_v1, %v960_v22 }
 0x204   :  { %v817_v28 = vpop.f32.mrb[69].mxu1 }
 0x205   :  { %v819_v30 = vpop.f32.mrb[70].mxu1  ;;  %1205 = vmatprep.mubr.bf16.mxu0 %v992_v27 }
 0x206   :  { %v902_v31 = vpack.c.bf16 %v819_v30, %v815_v25  ;;  %v821_v32 = vpop.f32.mrb[71].mxu1  ;;  %1206 = vmatmul.mubr.bf16.gmra.mrb[64].mxu0 %v991_v29 }
 0x207   :  { %v903_v33 = vpack.c.bf16 %v821_v32, %v817_v28 }
 0x208   :  { %v961_v34 = vadd.bf16 %v2019_v56, %v902_v31 }
 0x209   :  { %v962_v40 = vadd.bf16 %v2022_v58, %v903_v33 }
 0x20a   :  { %v993_v38 = vmax.bf16 %v1563_v1, %v961_v34 }
 0x20b   :  { %v825_v39 = vpop.f32.mrb[72].mxu1  ;;  %v994_v45 = vmax.bf16 %v1563_v1, %v962_v40 }
 0x20c   :  { %v827_v35 = vpop.f32.mrb[73].mxu1 }
 0x20d   :  { %v829_v48 = vpop.f32.mrb[74].mxu1  ;;  %1213 = vmatprep.mubr.bf16.mxu0 %v994_v45 }
 0x20e   :  { %v904_v41 = vpack.c.bf16 %v829_v48, %v825_v39  ;;  %v831_v51 = vpop.f32.mrb[75].mxu1  ;;  %1214 = vmatmul.mubr.bf16.gmra.mrb[68].mxu0 %v993_v38 }
 0x20f   :  { %v905_v11 = vpack.c.bf16 %v831_v51, %v827_v35  ;;  %v2091_v35 = vld [vmem:[%s2259_s6] ss:$0 sm:$0xff] }
 0x210   :  { %v963_v10 = vadd.bf16 %v2019_v56, %v904_v41 }
 0x211   :  { %v964_v37 = vadd.bf16 %v2022_v58, %v905_v11 }
 0x212   :  { %v995_v20 = vmax.bf16 %v1563_v1, %v963_v10 }
 0x213   :  { %v835_v36 = vpop.f32.mrb[76].mxu1  ;;  %v996_v63 = vmax.bf16 %v1563_v1, %v964_v37 }
 0x214   :  { %v837_v62 = vpop.f32.mrb[77].mxu1 }
 0x215   :  { %v839_v42 = vpop.f32.mrb[78].mxu1  ;;  %1221 = vmatprep.mubr.bf16.mxu0 %v996_v63 }
 0x216   :  { %v906_v43 = vpack.c.bf16 %v839_v42, %v835_v36  ;;  %v841_v44 = vpop.f32.mrb[79].mxu1  ;;  %1222 = vmatmul.mubr.bf16.gmra.mrb[72].mxu0 %v995_v20 }
 0x217   :  { %v907_v19 = vpack.c.bf16 %v841_v44, %v837_v62 }
 0x218   :  { %v965_v47 = vadd.bf16 %v2019_v56, %v906_v43 }
 0x219   :  { %v966_v46 = vadd.bf16 %v2022_v58, %v907_v19 }
 0x21a   :  { %v997_v53 = vmax.bf16 %v1563_v1, %v965_v47 }
 0x21b   :  { %v845_v49 = vpop.f32.mrb[80].mxu1  ;;  %v998_v50 = vmax.bf16 %v1563_v1, %v966_v46 }
 0x21c   :  { %v847_v52 = vpop.f32.mrb[81].mxu1 }
 0x21d   :  { %v849_v54 = vpop.f32.mrb[82].mxu1  ;;  %1229 = vmatprep.mubr.bf16.mxu0 %v998_v50 }
 0x21e   :  { %v908_v55 = vpack.c.bf16 %v849_v54, %v845_v49  ;;  %v851_v57 = vpop.f32.mrb[83].mxu1  ;;  %1230 = vmatmul.mubr.bf16.gmra.mrb[76].mxu0 %v997_v53 }
 0x21f   :  { %v909_v59 = vpack.c.bf16 %v851_v57, %v847_v52 }
 0x220   :  { %v967_v60 = vadd.bf16 %v2019_v56, %v908_v55 }
 0x221   :  { %v968_v61 = vadd.bf16 %v2022_v58, %v909_v59 }
 0x222   :  { %v999_v2 = vmax.bf16 %v1563_v1, %v967_v60 }
 0x223   :  { %v855_v0 = vpop.f32.mrb[84].mxu1  ;;  %v1000_v23 = vmax.bf16 %v1563_v1, %v968_v61 }
 0x224   :  { %v857_v26 = vpop.f32.mrb[85].mxu1 }
 0x225   :  { %v859_v3 = vpop.f32.mrb[86].mxu1  ;;  %1237 = vmatprep.mubr.bf16.mxu0 %v1000_v23 }
 0x226   :  { %v910_v4 = vpack.c.bf16 %v859_v3, %v855_v0  ;;  %v861_v5 = vpop.f32.mrb[87].mxu1  ;;  %1238 = vmatmul.mubr.bf16.gmra.mrb[80].mxu0 %v999_v2 }
 0x227   :  { %v911_v6 = vpack.c.bf16 %v861_v5, %v857_v26 }
 0x228   :  { %v969_v7 = vadd.bf16 %v2019_v56, %v910_v4 }
 0x229   :  { %v970_v24 = vadd.bf16 %v2022_v58, %v911_v6 }
 0x22a   :  { %v1001_v13 = vmax.bf16 %v1563_v1, %v969_v7 }
 0x22b   :  { %v865_v8 = vpop.f32.mrb[88].mxu1  ;;  %v1002_v9 = vmax.bf16 %v1563_v1, %v970_v24 }
 0x22c   :  { %v867_v12 = vpop.f32.mrb[89].mxu1 }
 0x22d   :  { %v869_v14 = vpop.f32.mrb[90].mxu1  ;;  %1245 = vmatprep.mubr.bf16.mxu0 %v1002_v9 }
 0x22e   :  { %v912_v15 = vpack.c.bf16 %v869_v14, %v865_v8  ;;  %v871_v16 = vpop.f32.mrb[91].mxu1  ;;  %1246 = vmatmul.mubr.bf16.gmra.mrb[84].mxu0 %v1001_v13 }
 0x22f   :  { %v913_v17 = vpack.c.bf16 %v871_v16, %v867_v12 }
 0x230   :  { %v971_v18 = vadd.bf16 %v2019_v56, %v912_v15 }
 0x231   :  { %v972_v21 = vadd.bf16 %v2022_v58, %v913_v17 }
 0x232   :  { %v1003_v28 = vmax.bf16 %v1563_v1, %v971_v18 }
 0x233   :  { %v875_v22 = vpop.f32.mrb[92].mxu1  ;;  %v1004_v25 = vmax.bf16 %v1563_v1, %v972_v21 }
 0x234   :  { %v877_v27 = vpop.f32.mrb[93].mxu1 }
 0x235   :  { %v879_v29 = vpop.f32.mrb[94].mxu1  ;;  %1253 = vmatprep.mubr.bf16.mxu0 %v1004_v25 }
 0x236   :  { %v914_v30 = vpack.c.bf16 %v879_v29, %v875_v22  ;;  %v881_v31 = vpop.f32.mrb[95].mxu1  ;;  %1254 = vmatmul.mubr.bf16.gmra.mrb[88].mxu0 %v1003_v28 }
 0x237   :  { %v915_v32 = vpack.c.bf16 %v881_v31, %v877_v27 }
 0x238   :  { %v973_v33 = vadd.bf16 %v2019_v56, %v914_v30 }
 0x239   :  { %v974_v34 = vadd.bf16 %v2022_v58, %v915_v32 }
 0x23a   :  { %v1005_v39 = vmax.bf16 %v1563_v1, %v973_v33 }
 0x23b   :  { %v1006_v40 = vmax.bf16 %v1563_v1, %v974_v34 }
 0x23d   :  { %1261 = vmatprep.mubr.bf16.mxu0 %v1006_v40 }
 0x23e   :  { %1262 = vmatmul.mubr.bf16.gmra.mrb[92].mxu0 %v1005_v39 }
 0x299   :  { %v1392_v45 = vpop.f32.mrb[32].mxu0 }
 0x29a   :  { %v1393_v38 = vpop.f32.mrb[33].mxu0 }
 0x29b   :  { %v1394_v48 = vadd.f32 %v1393_v38, %v1392_v45  ;;  %v1395_v41 = vpop.f32.mrb[34].mxu0 }
 0x29c   :  { %v1396_v51 = vpop.f32.mrb[35].mxu0 }
 0x29d   :  { %v1144_v56 = vadd.f32 %v1394_v48, %v2091_v35  ;;  %v1397_v58 = vadd.f32 %v1396_v51, %v1395_v41 }
 0x29f   :  { %1271 = vst.msk [vmem:[%s2260_s7] sm:$0xff] %vm1270_vm1, %v1144_v56  ;;  %v1147_v1 = vadd.f32 %v1397_v58, %v2091_v35 }
 0x2a1   :  { %1272 = vst.msk [vmem:[%s2260_s7 + $0x8] sm:$0xff] %vm1270_vm1, %v1147_v1  ;;  %v1398_v11 = vpop.f32.mrb[36].mxu0 }
 0x2a2   :  { %v1399_v10 = vpop.f32.mrb[37].mxu0 }
 0x2a3   :  { %v1400_v37 = vadd.f32 %v1399_v10, %v1398_v11  ;;  %v1401_v36 = vpop.f32.mrb[38].mxu0 }
 0x2a4   :  { %v1402_v63 = vpop.f32.mrb[39].mxu0 }
 0x2a5   :  { %v1152_v62 = vadd.f32 %v1400_v37, %v2091_v35  ;;  %v1403_v20 = vadd.f32 %v1402_v63, %v1401_v36 }
 0x2a7   :  { %1273 = vst.msk [vmem:[%s2260_s7 + $0x10] sm:$0xff] %vm1270_vm1, %v1152_v62  ;;  %v1155_v42 = vadd.f32 %v1403_v20, %v2091_v35 }
 0x2a9   :  { %1274 = vst.msk [vmem:[%s2260_s7 + $0x18] sm:$0xff] %vm1270_vm1, %v1155_v42  ;;  %v1404_v43 = vpop.f32.mrb[40].mxu0 }
 0x2aa   :  { %v1405_v44 = vpop.f32.mrb[41].mxu0 }
 0x2ab   :  { %v1406_v19 = vadd.f32 %v1405_v44, %v1404_v43  ;;  %v1407_v47 = vpop.f32.mrb[42].mxu0 }
 0x2ac   :  { %v1408_v46 = vpop.f32.mrb[43].mxu0 }
 0x2ad   :  { %v1160_v49 = vadd.f32 %v1406_v19, %v2091_v35  ;;  %v1409_v50 = vadd.f32 %v1408_v46, %v1407_v47 }
 0x2af   :  { %1275 = vst.msk [vmem:[%s2260_s7 + $0x20] sm:$0xff] %vm1270_vm1, %v1160_v49  ;;  %v1163_v52 = vadd.f32 %v1409_v50, %v2091_v35 }
 0x2b1   :  { %1276 = vst.msk [vmem:[%s2260_s7 + $0x28] sm:$0xff] %vm1270_vm1, %v1163_v52  ;;  %v1410_v53 = vpop.f32.mrb[44].mxu0 }
 0x2b2   :  { %v1411_v54 = vpop.f32.mrb[45].mxu0 }
 0x2b3   :  { %v1412_v55 = vadd.f32 %v1411_v54, %v1410_v53  ;;  %v1413_v57 = vpop.f32.mrb[46].mxu0 }
 0x2b4   :  { %v1414_v59 = vpop.f32.mrb[47].mxu0 }
 0x2b5   :  { %v1168_v60 = vadd.f32 %v1412_v55, %v2091_v35  ;;  %v1415_v61 = vadd.f32 %v1414_v59, %v1413_v57 }
 0x2b7   :  { %1277 = vst.msk [vmem:[%s2260_s7 + $0x30] sm:$0xff] %vm1270_vm1, %v1168_v60  ;;  %v1171_v0 = vadd.f32 %v1415_v61, %v2091_v35 }
 0x2b9   :  { %1278 = vst.msk [vmem:[%s2260_s7 + $0x38] sm:$0xff] %vm1270_vm1, %v1171_v0  ;;  %v1416_v23 = vpop.f32.mrb[48].mxu0 }
 0x2ba   :  { %v1417_v26 = vpop.f32.mrb[49].mxu0 }
 0x2bb   :  { %v1418_v2 = vadd.f32 %v1417_v26, %v1416_v23  ;;  %v1419_v3 = vpop.f32.mrb[50].mxu0 }
 0x2bc   :  { %v1420_v4 = vpop.f32.mrb[51].mxu0 }
 0x2bd   :  { %v1176_v5 = vadd.f32 %v1418_v2, %v2091_v35  ;;  %v1421_v6 = vadd.f32 %v1420_v4, %v1419_v3 }
 0x2bf   :  { %1279 = vst.msk [vmem:[%s2260_s7 + $0x40] sm:$0xff] %vm1270_vm1, %v1176_v5  ;;  %v1179_v7 = vadd.f32 %v1421_v6, %v2091_v35 }
 0x2c1   :  { %1280 = vst.msk [vmem:[%s2260_s7 + $0x48] sm:$0xff] %vm1270_vm1, %v1179_v7  ;;  %v1422_v24 = vpop.f32.mrb[52].mxu0 }
 0x2c2   :  { %v1423_v8 = vpop.f32.mrb[53].mxu0 }
 0x2c3   :  { %v1424_v9 = vadd.f32 %v1423_v8, %v1422_v24  ;;  %v1425_v12 = vpop.f32.mrb[54].mxu0 }
 0x2c4   :  { %v1426_v13 = vpop.f32.mrb[55].mxu0 }
 0x2c5   :  { %v1184_v14 = vadd.f32 %v1424_v9, %v2091_v35  ;;  %v1427_v15 = vadd.f32 %v1426_v13, %v1425_v12 }
 0x2c7   :  { %1281 = vst.msk [vmem:[%s2260_s7 + $0x50] sm:$0xff] %vm1270_vm1, %v1184_v14  ;;  %v1187_v16 = vadd.f32 %v1427_v15, %v2091_v35 }
 0x2c9   :  { %1282 = vst.msk [vmem:[%s2260_s7 + $0x58] sm:$0xff] %vm1270_vm1, %v1187_v16  ;;  %v1428_v17 = vpop.f32.mrb[56].mxu0 }
 0x2ca   :  { %v1429_v18 = vpop.f32.mrb[57].mxu0 }
 0x2cb   :  { %v1430_v21 = vadd.f32 %v1429_v18, %v1428_v17  ;;  %v1431_v22 = vpop.f32.mrb[58].mxu0 }
 0x2cc   :  { %v1432_v25 = vpop.f32.mrb[59].mxu0 }
 0x2cd   :  { %v1192_v27 = vadd.f32 %v1430_v21, %v2091_v35  ;;  %v1433_v28 = vadd.f32 %v1432_v25, %v1431_v22 }
 0x2cf   :  { %1283 = vst.msk [vmem:[%s2260_s7 + $0x60] sm:$0xff] %vm1270_vm1, %v1192_v27  ;;  %v1195_v29 = vadd.f32 %v1433_v28, %v2091_v35 }
 0x2d1   :  { %1284 = vst.msk [vmem:[%s2260_s7 + $0x68] sm:$0xff] %vm1270_vm1, %v1195_v29  ;;  %v1434_v30 = vpop.f32.mrb[60].mxu0 }
 0x2d2   :  { %v1435_v31 = vpop.f32.mrb[61].mxu0 }
 0x2d3   :  { %v1436_v32 = vadd.f32 %v1435_v31, %v1434_v30  ;;  %v1437_v33 = vpop.f32.mrb[62].mxu0 }
 0x2d4   :  { %v1438_v34 = vpop.f32.mrb[63].mxu0 }
 0x2d5   :  { %v1200_v40 = vadd.f32 %v1436_v32, %v2091_v35  ;;  %v1439_v39 = vadd.f32 %v1438_v34, %v1437_v33 }
 0x2d7   :  { %1285 = vst.msk [vmem:[%s2260_s7 + $0x70] sm:$0xff] %vm1270_vm1, %v1200_v40  ;;  %v1203_v45 = vadd.f32 %v1439_v39, %v2091_v35 }
 0x2d9   :  { %1286 = vst.msk [vmem:[%s2260_s7 + $0x78] sm:$0xff] %vm1270_vm1, %v1203_v45  ;;  %v1440_v38 = vpop.f32.mrb[64].mxu0 }
 0x2da   :  { %v1441_v48 = vpop.f32.mrb[65].mxu0 }
 0x2db   :  { %v1442_v41 = vadd.f32 %v1441_v48, %v1440_v38  ;;  %v1443_v51 = vpop.f32.mrb[66].mxu0 }
 0x2dc   :  { %v1444_v56 = vpop.f32.mrb[67].mxu0 }
 0x2dd   :  { %v1208_v58 = vadd.f32 %v1442_v41, %v2091_v35  ;;  %v1445_v1 = vadd.f32 %v1444_v56, %v1443_v51 }
 0x2df   :  { %1287 = vst.msk [vmem:[%s2260_s7 + $0x80] sm:$0xff] %vm1270_vm1, %v1208_v58  ;;  %v1211_v11 = vadd.f32 %v1445_v1, %v2091_v35 }
 0x2e1   :  { %1288 = vst.msk [vmem:[%s2260_s7 + $0x88] sm:$0xff] %vm1270_vm1, %v1211_v11  ;;  %v1446_v10 = vpop.f32.mrb[68].mxu0 }
 0x2e2   :  { %v1447_v37 = vpop.f32.mrb[69].mxu0 }
 0x2e3   :  { %v1448_v36 = vadd.f32 %v1447_v37, %v1446_v10  ;;  %v1449_v63 = vpop.f32.mrb[70].mxu0 }
 0x2e4   :  { %v1450_v62 = vpop.f32.mrb[71].mxu0 }
 0x2e5   :  { %v1216_v20 = vadd.f32 %v1448_v36, %v2091_v35  ;;  %v1451_v42 = vadd.f32 %v1450_v62, %v1449_v63 }
 0x2e7   :  { %1289 = vst.msk [vmem:[%s2260_s7 + $0x90] sm:$0xff] %vm1270_vm1, %v1216_v20  ;;  %v1219_v43 = vadd.f32 %v1451_v42, %v2091_v35 }
 0x2e9   :  { %1290 = vst.msk [vmem:[%s2260_s7 + $0x98] sm:$0xff] %vm1270_vm1, %v1219_v43  ;;  %v1452_v44 = vpop.f32.mrb[72].mxu0 }
 0x2ea   :  { %v1453_v19 = vpop.f32.mrb[73].mxu0 }
 0x2eb   :  { %v1454_v47 = vadd.f32 %v1453_v19, %v1452_v44  ;;  %v1455_v46 = vpop.f32.mrb[74].mxu0 }
 0x2ec   :  { %v1456_v49 = vpop.f32.mrb[75].mxu0 }
 0x2ed   :  { %v1224_v50 = vadd.f32 %v1454_v47, %v2091_v35  ;;  %v1457_v52 = vadd.f32 %v1456_v49, %v1455_v46 }
 0x2ef   :  { %1291 = vst.msk [vmem:[%s2260_s7 + $0xa0] sm:$0xff] %vm1270_vm1, %v1224_v50  ;;  %v1227_v53 = vadd.f32 %v1457_v52, %v2091_v35 }
 0x2f1   :  { %1292 = vst.msk [vmem:[%s2260_s7 + $0xa8] sm:$0xff] %vm1270_vm1, %v1227_v53  ;;  %v1458_v54 = vpop.f32.mrb[76].mxu0 }
 0x2f2   :  { %v1459_v55 = vpop.f32.mrb[77].mxu0 }
 0x2f3   :  { %v1460_v57 = vadd.f32 %v1459_v55, %v1458_v54  ;;  %v1461_v59 = vpop.f32.mrb[78].mxu0 }
 0x2f4   :  { %v1462_v60 = vpop.f32.mrb[79].mxu0 }
 0x2f5   :  { %v1232_v61 = vadd.f32 %v1460_v57, %v2091_v35  ;;  %v1463_v0 = vadd.f32 %v1462_v60, %v1461_v59 }
 0x2f7   :  { %1293 = vst.msk [vmem:[%s2260_s7 + $0xb0] sm:$0xff] %vm1270_vm1, %v1232_v61  ;;  %v1235_v23 = vadd.f32 %v1463_v0, %v2091_v35 }
 0x2f9   :  { %1294 = vst.msk [vmem:[%s2260_s7 + $0xb8] sm:$0xff] %vm1270_vm1, %v1235_v23  ;;  %v1464_v26 = vpop.f32.mrb[80].mxu0 }
 0x2fa   :  { %v1465_v2 = vpop.f32.mrb[81].mxu0 }
 0x2fb   :  { %v1466_v3 = vadd.f32 %v1465_v2, %v1464_v26  ;;  %v1467_v4 = vpop.f32.mrb[82].mxu0 }
 0x2fc   :  { %v1468_v5 = vpop.f32.mrb[83].mxu0 }
 0x2fd   :  { %v1240_v6 = vadd.f32 %v1466_v3, %v2091_v35  ;;  %v1469_v7 = vadd.f32 %v1468_v5, %v1467_v4 }
 0x2ff   :  { %1295 = vst.msk [vmem:[%s2260_s7 + $0xc0] sm:$0xff] %vm1270_vm1, %v1240_v6  ;;  %v1243_v24 = vadd.f32 %v1469_v7, %v2091_v35 }
 0x301   :  { %1296 = vst.msk [vmem:[%s2260_s7 + $0xc8] sm:$0xff] %vm1270_vm1, %v1243_v24  ;;  %v1470_v8 = vpop.f32.mrb[84].mxu0 }
 0x302   :  { %v1471_v9 = vpop.f32.mrb[85].mxu0 }
 0x303   :  { %v1472_v12 = vadd.f32 %v1471_v9, %v1470_v8  ;;  %v1473_v13 = vpop.f32.mrb[86].mxu0 }
 0x304   :  { %v1474_v14 = vpop.f32.mrb[87].mxu0 }
 0x305   :  { %v1248_v15 = vadd.f32 %v1472_v12, %v2091_v35  ;;  %v1475_v16 = vadd.f32 %v1474_v14, %v1473_v13 }
 0x307   :  { %1297 = vst.msk [vmem:[%s2260_s7 + $0xd0] sm:$0xff] %vm1270_vm1, %v1248_v15  ;;  %v1251_v17 = vadd.f32 %v1475_v16, %v2091_v35 }
 0x309   :  { %1298 = vst.msk [vmem:[%s2260_s7 + $0xd8] sm:$0xff] %vm1270_vm1, %v1251_v17  ;;  %v1476_v18 = vpop.f32.mrb[88].mxu0 }
 0x30a   :  { %v1477_v21 = vpop.f32.mrb[89].mxu0 }
 0x30b   :  { %v1478_v22 = vadd.f32 %v1477_v21, %v1476_v18  ;;  %v1479_v25 = vpop.f32.mrb[90].mxu0 }
 0x30c   :  { %v1480_v27 = vpop.f32.mrb[91].mxu0 }
 0x30d   :  { %v1256_v28 = vadd.f32 %v1478_v22, %v2091_v35  ;;  %v1481_v29 = vadd.f32 %v1480_v27, %v1479_v25 }
 0x30f   :  { %1299 = vst.msk [vmem:[%s2260_s7 + $0xe0] sm:$0xff] %vm1270_vm1, %v1256_v28  ;;  %v1259_v30 = vadd.f32 %v1481_v29, %v2091_v35 }
 0x311   :  { %1300 = vst.msk [vmem:[%s2260_s7 + $0xe8] sm:$0xff] %vm1270_vm1, %v1259_v30  ;;  %v1482_v31 = vpop.f32.mrb[92].mxu0 }
 0x312   :  { %v1483_v32 = vpop.f32.mrb[93].mxu0 }
 0x313   :  { %v1484_v33 = vadd.f32 %v1483_v32, %v1482_v31  ;;  %v1485_v34 = vpop.f32.mrb[94].mxu0 }
 0x314   :  { %v1486_v40 = vpop.f32.mrb[95].mxu0 }
 0x315   :  { %v1264_v39 = vadd.f32 %v1484_v33, %v2091_v35  ;;  %v1487_v45 = vadd.f32 %v1486_v40, %v1485_v34 }
 0x317   :  { %1301 = vst.msk [vmem:[%s2260_s7 + $0xf0] sm:$0xff] %vm1270_vm1, %v1264_v39  ;;  %v1267_v38 = vadd.f32 %v1487_v45, %v2091_v35 }
 0x319   :  { %1302 = vst.msk [vmem:[%s2260_s7 + $0xf8] sm:$0xff] %vm1270_vm1, %v1267_v38 }

</bundles_post_ra>
